<compile_context>
chip_gen: v6e
topology: v6e:2x2x1
jax: 0.10.0
libtpu: 0.0.40
codegen_flags: <defaults>
</compile_context>

<pallas_src>
import functools

import jax
import jax.numpy as jnp
from jax.experimental import pallas as pl
from jax.experimental.pallas import tpu as pltpu


def _round_up(x: int, m: int) -> int:
    return (x + m - 1) // m * m


def _vmem_budget_bytes() -> int:
    """0.75x of the per-core VMEM capacity; conservative fallback if unqueryable."""
    try:
        cap = int(pltpu.get_tpu_info().vmem_capacity_bytes)
    except Exception:
        cap = 64 << 20  # v7x per-TensorCore capacity (smallest of v5e/v6e/v7x)
    return int(0.75 * cap)


def _mlp_kernel(xT_ref, w1_ref, b1_ref, w2_ref, b2_ref, o_ref, *, sigmoid: bool):
    # xT_ref: (D, TB)    batch tile, lanes = batch
    # w1_ref: (H_s, D)   first layer (PyTorch layout), VMEM-resident
    # b1_ref: (H_s, 1)   broadcasts over lanes
    # w2_ref: (1, H_s)   second layer, VMEM-resident
    # b2_ref: (1,)       SMEM scalar
    # o_ref:  (1, TB)    lane-dense output row (lanes = batch)
    h = jnp.dot(w1_ref[...], xT_ref[...], preferred_element_type=jnp.float32)  # (H_s, TB)
    h = jnp.tanh(h + b1_ref[...])                                              # sublane-H tanh
    out = jnp.dot(w2_ref[...], h, preferred_element_type=jnp.float32)          # (1, TB)
    out = out + b2_ref[0]
    if sigmoid:
        out = jax.nn.sigmoid(out)
    o_ref[...] = out.astype(o_ref.dtype)


@functools.partial(jax.jit, static_argnames=("sigmoid", "block_b"))
def mlp_classifier_forward(x, w1, b1, w2, b2, sigmoid=False, block_b=None):
    """Forward pass of MLPClassifier: sigmoid?(tanh(x @ W1^T + b1) @ W2^T + b2).

    x: (B, D) float32; w1: (H, D); b1: (H,); w2: (1, H); b2: (1,)  (PyTorch layout).
    Returns (B, 1) float32.
    """
    B, D = x.shape
    H = w1.shape[0]

    # --- one-time weight layout plumbing: hidden dim on the sublane axis (pad to 8) ---
    H_s = _round_up(max(H, 1), 8)
    w1p = jnp.pad(w1.astype(jnp.float32), ((0, H_s - H), (0, 0)))                    # (H_s, D)
    b1p = jnp.pad(b1.astype(jnp.float32).reshape(H, 1), ((0, H_s - H), (0, 0)))      # (H_s, 1)
    w2p = jnp.pad(w2.astype(jnp.float32).reshape(1, H), ((0, 0), (0, H_s - H)))      # (1, H_s)
    b2p = b2.astype(jnp.float32).reshape(1)                                          # SMEM scalar

    # --- batch tiling: lanes = batch, TB multiple of 128, D-aware default ---
    B128 = _round_up(B, 128)
    if block_b is None:
        # keep a single x^T tile around <= 4 MiB; clamp to [512, 4096] rows
        block_b = int(min(4096, max(512, (4 << 20) // max(D * 4, 1))))
    TB = _round_up(min(block_b, B128), 128)
    # keep >= 2 grid steps when the batch allows it (v7x: 2 TensorCores shard "parallel")
    half = (B128 // 2) // 128 * 128
    if half >= 128 and TB > half:
        TB = half
    B_pad = _round_up(B, TB)
    grid = (B_pad // TB,)

    xT = x.astype(jnp.float32).T                      # (D, B): one-time wrapper transpose
    if B_pad != B:
        xT = jnp.pad(xT, ((0, 0), (0, B_pad - B)))

    # VMEM budget: double-buffered x^T/out tiles + resident weights + hidden activations.
    budget = _vmem_budget_bytes()
    needed = (2 * D * TB * 4 + 2 * 8 * TB * 4
              + 2 * (H_s * D + H_s * 128 + 8 * 128) * 4
              + 2 * H_s * TB * 4 + (4 << 20))
    vmem_limit = int(max(32 << 20, min(needed, budget)))
    # TODO(synk): for very large D (resident w1 approaching the VMEM budget) add a
    # D-reduction grid axis with an f32 accumulator scratch instead of a resident w1.

    cost = pl.CostEstimate(
        flops=2 * B_pad * D * H_s + 2 * B_pad * H_s,
        transcendentals=B_pad * H_s + (B_pad if sigmoid else 0),
        bytes_accessed=(B_pad * D + H_s * D + 2 * H_s + 1 + B_pad) * 4,
    )

    kernel = functools.partial(_mlp_kernel, sigmoid=sigmoid)

    out_row = pl.pallas_call(
        kernel,
        out_shape=jax.ShapeDtypeStruct((1, B_pad), jnp.float32),
        grid_spec=pltpu.PrefetchScalarGridSpec(
            num_scalar_prefetch=0,
            grid=grid,
            in_specs=[
                pl.BlockSpec((D, TB), lambda i: (0, i)),            # x^T: tiled over batch
                pl.BlockSpec((H_s, D), lambda i: (0, 0)),           # w1: resident
                pl.BlockSpec((H_s, 1), lambda i: (0, 0)),           # b1: resident
                pl.BlockSpec((1, H_s), lambda i: (0, 0)),           # w2: resident
                pl.BlockSpec(memory_space=pltpu.MemorySpace.SMEM),  # b2: scalar in SMEM
            ],
            out_specs=pl.BlockSpec((1, TB), lambda i: (0, i)),      # lane-dense output row
        ),
        compiler_params=pltpu.CompilerParams(
            dimension_semantics=("parallel",),
            vmem_limit_bytes=vmem_limit,
        ),
        cost_estimate=cost,
    )(xT, w1p, b1p, w2p, b2p)

    return out_row[0, :B].reshape(B, 1)


def init_params(key, input_dim, hidden_dim=10):
    """Deterministic PyTorch-style (uniform +/- 1/sqrt(fan_in)) initialization."""
    k1, k2, k3, k4 = jax.random.split(key, 4)
    bound1 = 1.0 / jnp.sqrt(input_dim)
    bound2 = 1.0 / jnp.sqrt(hidden_dim)
    w1 = jax.random.uniform(k1, (hidden_dim, input_dim), jnp.float32, -bound1, bound1)
    b1 = jax.random.uniform(k2, (hidden_dim,), jnp.float32, -bound1, bound1)
    w2 = jax.random.uniform(k3, (1, hidden_dim), jnp.float32, -bound2, bound2)
    b2 = jax.random.uniform(k4, (1,), jnp.float32, -bound2, bound2)
    return w1, b1, w2, b2


if __name__ == "__main__":
    key = jax.random.PRNGKey(0)
    kx, kp, kx2 = jax.random.split(key, 3)

    batch, input_dim, hidden_dim = 8, 16, 10
    x = jax.random.normal(kx, (batch, input_dim), jnp.float32)
    w1, b1, w2, b2 = init_params(kp, input_dim, hidden_dim)

    # Forward without sigmoid (default) and with sigmoid (single-tile grid).
    out = mlp_classifier_forward(x, w1, b1, w2, b2, sigmoid=False)
    out_sig = mlp_classifier_forward(x, w1, b1, w2, b2, sigmoid=True)
    jax.block_until_ready(out)
    jax.block_until_ready(out_sig)

    ref = jnp.tanh(x @ w1.T + b1) @ w2.T + b2
    ref_sig = jax.nn.sigmoid(ref)
    assert out.shape == (batch, 1)
    assert jnp.allclose(out, ref, atol=1e-4), "mismatch (no sigmoid)"
    assert jnp.allclose(out_sig, ref_sig, atol=1e-4), "mismatch (sigmoid)"

    # Multi-tile grid path: batch not a multiple of the tile -> padding + 3 grid steps.
    batch2 = 300
    x2 = jax.random.normal(kx2, (batch2, input_dim), jnp.float32)
    out2 = mlp_classifier_forward(x2, w1, b1, w2, b2, sigmoid=True, block_b=128)
    jax.block_until_ready(out2)
    ref2 = jax.nn.sigmoid(jnp.tanh(x2 @ w1.T + b1) @ w2.T + b2)
    assert out2.shape == (batch2, 1)
    assert jnp.allclose(out2, ref2, atol=1e-4), "mismatch (tiled batch)"

    print("KERNEL_OK")
</pallas_src>

<mosaic_0001>
module attributes {stable_mosaic.version = 11 : i64} {
  func.func @_mlp_kernel(%arg0: i32, %arg1: memref<16x128xf32, #tpu.memory_space<vmem>>, %arg2: memref<16x16xf32, #tpu.memory_space<vmem>>, %arg3: memref<16x1xf32, #tpu.memory_space<vmem>>, %arg4: memref<1x16xf32, #tpu.memory_space<vmem>>, %arg5: memref<1xf32, #tpu.memory_space<smem>>, %arg6: memref<1x128xf32, #tpu.memory_space<vmem>>) attributes {dimension_semantics = [#tpu.dimension_semantics<parallel>], iteration_bounds = array<i64: 1>, scalar_prefetch = 0 : i64, scratch_operands = 0 : i64, tpu.core_type = #tpu.core_type<tc>, window_params = [{transform_indices = @transform_0, window_bounds = array<i64: 16, 128>}, {pipeline_mode = #tpu.pipeline_mode<synchronous>, transform_indices = @transform_1, window_bounds = array<i64: 16, 16>}, {pipeline_mode = #tpu.pipeline_mode<synchronous>, transform_indices = @transform_2, window_bounds = array<i64: 16, 1>}, {pipeline_mode = #tpu.pipeline_mode<synchronous>, transform_indices = @transform_3, window_bounds = array<i64: 1, 16>}, {transform_indices = @transform_4, window_bounds = array<i64: 1>}, {transform_indices = @transform_5, window_bounds = array<i64: 1, 128>}]} {
    %c0 = arith.constant 0 : index
    %c0_0 = arith.constant 0 : index
    %0 = vector.load %arg2[%c0, %c0_0] : memref<16x16xf32, #tpu.memory_space<vmem>>, vector<16x16xf32>
    %c0_1 = arith.constant 0 : index
    %c0_2 = arith.constant 0 : index
    %1 = vector.load %arg1[%c0_1, %c0_2] : memref<16x128xf32, #tpu.memory_space<vmem>>, vector<16x128xf32>
    %cst = arith.constant dense<0.000000e+00> : vector<16x128xf32>
    %2 = tpu.matmul %0, %1, %cst {dimension_numbers = #tpu.dot_dimension_numbers<[1], [0], [0], [1], [0, 0, 1, 1], [], []>} : vector<16x16xf32>, vector<16x128xf32>, vector<16x128xf32> -> vector<16x128xf32>
    %c0_3 = arith.constant 0 : index
    %c0_4 = arith.constant 0 : index
    %3 = vector.load %arg3[%c0_3, %c0_4] : memref<16x1xf32, #tpu.memory_space<vmem>>, vector<16x1xf32>
    %4 = vector.broadcast %3 : vector<16x1xf32> to vector<16x128xf32>
    %5 = arith.addf %2, %4 : vector<16x128xf32>
    %6 = math.tanh %5 : vector<16x128xf32>
    %c0_5 = arith.constant 0 : index
    %c0_6 = arith.constant 0 : index
    %7 = vector.load %arg4[%c0_5, %c0_6] : memref<1x16xf32, #tpu.memory_space<vmem>>, vector<1x16xf32>
    %cst_7 = arith.constant dense<0.000000e+00> : vector<1x128xf32>
    %8 = tpu.matmul %7, %6, %cst_7 {dimension_numbers = #tpu.dot_dimension_numbers<[1], [0], [0], [1], [0, 0, 1, 1], [], []>} : vector<1x16xf32>, vector<16x128xf32>, vector<1x128xf32> -> vector<1x128xf32>
    %c0_8 = arith.constant 0 : index
    %9 = memref.load %arg5[%c0_8] : memref<1xf32, #tpu.memory_space<smem>>
    %10 = vector.broadcast %9 : f32 to vector<1x128xf32>
    %11 = arith.addf %8, %10 : vector<1x128xf32>
    %c0_9 = arith.constant 0 : index
    %c0_10 = arith.constant 0 : index
    %12 = vector.load %arg6[%c0_9, %c0_10] : memref<1x128xf32, #tpu.memory_space<vmem>>, vector<1x128xf32>
    tpu.vector_store %arg6[%c0_9, %c0_10], %11 {strides = array<i32>} : memref<1x128xf32, #tpu.memory_space<vmem>>, vector<1x128xf32>,
    return
  }
  func.func @transform_0(%arg0: i32) -> (i32, i32) {
    %c0_i32 = arith.constant 0 : i32
    %c0_i32_0 = arith.constant 0 : i32
    return %c0_i32, %arg0 : i32, i32
  }
  func.func @transform_1(%arg0: i32) -> (i32, i32) {
    %c0_i32 = arith.constant 0 : i32
    %c0_i32_0 = arith.constant 0 : i32
    %c0_i32_1 = arith.constant 0 : i32
    return %c0_i32, %c0_i32_0 : i32, i32
  }
  func.func @transform_2(%arg0: i32) -> (i32, i32) {
    %c0_i32 = arith.constant 0 : i32
    %c0_i32_0 = arith.constant 0 : i32
    %c0_i32_1 = arith.constant 0 : i32
    return %c0_i32, %c0_i32_0 : i32, i32
  }
  func.func @transform_3(%arg0: i32) -> (i32, i32) {
    %c0_i32 = arith.constant 0 : i32
    %c0_i32_0 = arith.constant 0 : i32
    %c0_i32_1 = arith.constant 0 : i32
    return %c0_i32, %c0_i32_0 : i32, i32
  }
  func.func @transform_4(%arg0: i32) -> i32 {
    %c0_i32 = arith.constant 0 : i32
    %c0_i32_0 = arith.constant 0 : i32
    return %c0_i32 : i32
  }
  func.func @transform_5(%arg0: i32) -> (i32, i32) {
    %c0_i32 = arith.constant 0 : i32
    %c0_i32_0 = arith.constant 0 : i32
    return %c0_i32, %arg0 : i32, i32
  }
}

</mosaic_0001>

<bundles_post_ra>
// kernel: mlp_classifier_forward.1
= control target key start
LH: loop header
LB: loop body
LE: loop exit
PB: predicated region body
PF: predicated region fallthrough
CT: control target
= control target key end

     0   :  { %vm37_vm0 = vcmask 130048   ;;  %v234_v3 = vmov 0   ;;  %v235_v7 = vmov 0.0   ;;  %vm236_vm1 = vmmov 0   ;;  %s297_s0 = inlined_call_operand.vmem [shape: f32[16,128], index: 0, kind: input, shape index: {}]   ;;  %s298_s1 = inlined_call_operand.vmem [shape: f32[16,16], index: 1, kind: input, shape index: {}]   ;;  %s299_s2 = inlined_call_operand.vmem [shape: f32[16,1], index: 2, kind: input, shape index: {}]   ;;  %s300_s3 = inlined_call_operand.vmem [shape: f32[1,16], index: 3, kind: input, shape index: {}]   ;;  %s301_s4 = inlined_call_operand.<no memory space> [shape: f32[1], index: 4, kind: input, shape index: {}]   ;;  %s302_s5 = inlined_call_operand.vmem [shape: f32[1,128], index: 5, kind: output, shape index: {}]  }
   0x1   :  { %v24_v0 = vld [vmem:[%s297_s0 + $0x8] sm:$0xff]  ;;  %v23_v1 = vld [vmem:[%s297_s0] sm:$0xff]  ;;  %229 = vset.pattern.permute.xlu0 %v234_v3  ;;  %219 = vmatprep.subr.mxu1 %v235_v7  ;;  %v123_v17 = vstv %s301_s4 }
   0x2   :  { %v21_v2 = vld [vmem:[%s298_s1] sm:$0xff]  ;;  %212 = vmatprep.subr.mxu0 %v24_v0  ;;  %v26_v4 = vld [vmem:[%s299_s2 + $0x8] sm:$0xff]  ;;  %223 = vmatprep.mubr.msk.f32.mxu1 %vm236_vm1, %v235_v7 }
   0x3   :  { %216 = vmatprep.mubr.msk.f32.mxu0 %vm37_vm0, %v21_v2  ;;  %213 = vmatpush3.msra.mxu0 %v24_v0  ;;  %v22_v5 = vld [vmem:[%s298_s1 + $0x8] sm:$0xff]  ;;  %v25_v6 = vld [vmem:[%s299_s2] sm:$0xff] }
   0x4   :  { %34 = vperm.xlu0 %229, %v26_v4   ;;  %214 = vmatprep.subr.mxu0 %v23_v1  ;;  %v121_v15 = vld [vmem:[%s300_s3] sm:$0x1] }
   0x5   :  { %215 = vmatpush3.msra.mxu0 %v23_v1 }
   0x6   :  { %217 = vmatmul.mubr.msk.f32.vlgmr.msra.gmra.mxu0 %vm37_vm0, %v22_v5 }
   0x8   :  { %29 = vperm.xlu0 %229, %v25_v6  }
  0x7f   :  { %v35_v8 = vpop.permute.xlu0 %34 }
  0x83   :  { %v30_v11 = vpop.permute.xlu0 %29 }
  0xc6   :  { %v218_v9 = vpop.f32.mrf.mxu0 }
  0xc7   :  { %v116_v10 = vadd.f32 %v218_v9, %v35_v8 }
  0xc8   :  { %v110_v12 = vpop.f32.mrf.mxu0 }
  0xc9   :  { %230 = vtanh.f32 %v116_v10  ;;  %v111_v13 = vadd.f32 %v110_v12, %v30_v11 }
  0xcb   :  { %232 = vtanh.f32 %v111_v13 }
  0xd6   :  { %v231_v14 = vpop.eup %230 }
  0xd7   :  { %220 = vmatpush3.msra.mxu1 %v231_v14 }
  0xd8   :  { %v233_v16 = vpop.eup %232  ;;  %221 = vmatprep.subr.mxu1 %v235_v7 }
  0xd9   :  { %222 = vmatpush3.msra.mxu1 %v233_v16 }
  0xda   :  { %224 = vmatmul.mubr.msk.f32.vlgmr.msra.gmra.mxu1 %vm37_vm0, %v121_v15 }
 0x19a   :  { %v193_v18 = vpop.f32.mrf.mxu1 }
 0x19b   :  { %v194_v19 = vadd.f32 %v193_v18, %v123_v17 }
 0x19c   :  { %v225_v20 = vpop.f32.mrf.mxu1 }
 0x19d   :  { %197 = vst [vmem:[%s302_s5] sm:$0x1] %v194_v19 }

</bundles_post_ra>
